<compile_context>
chip_gen: v7x
topology: tpu7x:2x2x1
jax: 0.10.0
libtpu: 0.0.40
codegen_flags: <defaults>
</compile_context>

<pallas_src>
from functools import partial

import jax
import jax.numpy as jnp
from jax.experimental import pallas as pl
from jax.experimental.pallas import tpu as pltpu


# VMEM budget for everything a single grid step keeps live:
#   2 x input tile  (double-buffered stream)
# + 2 x output tile (double-buffered stream)
# + ~2 x f32 intermediates of the tile (x32 and the normalized temp).
# 16 MiB is comfortably inside v7x's 64 MiB physical VMEM and already well past
# the ~85% HBM-roofline plateau on v5e/v6e.
_TILE_VMEM_BUDGET_BYTES = 16 * 1024 * 1024
_MAX_TILE_ROWS = 512
# Minimum number of grid steps on large inputs: keeps the software pipeline
# busy and gives v7x's 2 TensorCores a balanced row split.
_MIN_GRID_STEPS = 8


def _choose_tile_rows(R, H, in_dtype, out_dtype, max_tile_rows=None):
    """Row-tile size: VMEM-budgeted (incl. f32 temps), >= _MIN_GRID_STEPS steps."""
    in_b = jnp.dtype(in_dtype).itemsize
    out_b = jnp.dtype(out_dtype).itemsize
    # sublane packing multiple for the 2nd-minor axis: 8 (f32) / 16 (bf16) / 32 (int8)
    sub = max(8, 32 // min(in_b, out_b))

    # Bytes live per tile row: double-buffered in + out streams + two f32 temps.
    per_row = H * (2 * in_b + 2 * out_b + 2 * 4)
    rows = max(1, _TILE_VMEM_BUDGET_BYTES // per_row)
    rows = min(rows, _MAX_TILE_ROWS)

    # Force at least _MIN_GRID_STEPS grid steps whenever the input is big enough
    # for pipelining / 2-TC balance to matter.
    if R >= _MIN_GRID_STEPS * sub:
        rows = min(rows, pl.cdiv(R, _MIN_GRID_STEPS))

    # Round down to the sublane multiple (block dim must be 8-aligned or == R).
    rows = max(sub, (rows // sub) * sub)

    if max_tile_rows is not None:             # test / override hook
        rows = min(rows, max(sub, (int(max_tile_rows) // sub) * sub))

    if R <= rows:
        # Small input: single full-extent block (block dims == array dims -> legal).
        return R
    return rows


def _rmsnorm_kernel(x_ref, w_ref, o_ref, *, eps, input_dtype):
    # x_ref: (tile_rows, H), w_ref: (1, H), o_ref: (tile_rows, H)
    x32 = x_ref[...].astype(jnp.float32)
    var = jnp.mean(x32 * x32, axis=-1, keepdims=True)     # (tile_rows, 1), f32 accumulate
    inv = jax.lax.rsqrt(var + eps)                         # EUP rsqrt
    xnorm = (x32 * inv).astype(input_dtype)                # cast back to input dtype (torch)
    # weight * xnorm with torch promotion (weight dtype x input_dtype activations)
    o_ref[...] = (w_ref[...] * xnorm).astype(o_ref.dtype)


def qwen2_rmsnorm(hidden_states, weight, eps=1e-6, *,
                  weight_in_input_dtype=False, max_tile_rows=None):
    """hidden_states: (..., H). weight: (H,). Matches Qwen2RMSNorm.forward.

    weight_in_input_dtype=True pre-casts the weight to the activation dtype
    (HF deployed-model semantics) so the output (and its HBM write traffic)
    stays in the activation dtype. Default False = exact torch promotion.
    """
    orig_shape = hidden_states.shape
    input_dtype = hidden_states.dtype
    H = orig_shape[-1]
    x2d = hidden_states.reshape(-1, H)
    R = x2d.shape[0]

    if weight_in_input_dtype:
        weight = weight.astype(input_dtype)
    w2d = weight.reshape(1, H)

    # Output dtype follows torch promotion of weight * activations.
    out_dtype = jnp.promote_types(weight.dtype, input_dtype)

    tile_rows = _choose_tile_rows(R, H, input_dtype, out_dtype, max_tile_rows)
    grid = pl.cdiv(R, tile_rows)

    in_b = jnp.dtype(input_dtype).itemsize
    out_b = jnp.dtype(out_dtype).itemsize
    w_b = jnp.dtype(weight.dtype).itemsize

    # Per-step VMEM footprint: double-buffered in/out streams + f32 temps + weight.
    tile_elems = tile_rows * H
    need = tile_elems * (2 * in_b + 2 * out_b + 2 * 4) + H * w_b + (2 << 20)
    # Explicit scoped-VMEM limit (v5e default is only 16 MiB), capped below v7x's
    # 64 MiB physical VMEM with headroom for compiler scratch.
    vmem_limit = int(min(48 << 20, max(need, 16 << 20)))

    kernel = partial(_rmsnorm_kernel, eps=float(eps), input_dtype=input_dtype)

    cost = pl.CostEstimate(
        flops=int(4 * R * H),                 # square + reduce + normalize + weight mul
        transcendentals=int(R),               # one rsqrt per row
        bytes_accessed=int(R * H * (in_b + out_b) + H * w_b),
    )

    out = pl.pallas_call(
        kernel,
        out_shape=jax.ShapeDtypeStruct((R, H), out_dtype),
        grid_spec=pltpu.PrefetchScalarGridSpec(
            num_scalar_prefetch=0,
            grid=(grid,),
            in_specs=[
                # Activation stream: lane-dense full-H row tiles; ragged tail
                # reads padded rows but its writeback past R is masked by Pallas.
                pl.BlockSpec((tile_rows, H), lambda i: (i, 0)),
                # Weight: constant block index -> stays resident, no re-fetch per step.
                pl.BlockSpec((1, H), lambda i: (0, 0)),
            ],
            out_specs=pl.BlockSpec((tile_rows, H), lambda i: (i, 0)),
        ),
        compiler_params=pltpu.CompilerParams(
            dimension_semantics=("parallel",),   # rows shard across v7x's 2 TensorCores
            vmem_limit_bytes=vmem_limit,
        ),
        cost_estimate=cost,
    )(x2d, w2d)

    return out.reshape(orig_shape[:-1] + (H,))


def _reference_rmsnorm(x, w, eps=1e-6):
    input_dtype = x.dtype
    x32 = x.astype(jnp.float32)
    var = jnp.mean(x32 * x32, axis=-1, keepdims=True)
    xnorm = x32 * jax.lax.rsqrt(var + eps)
    return w * xnorm.astype(input_dtype)


if __name__ == "__main__":
    key = jax.random.PRNGKey(0)
    k1, k2, k3, k4 = jax.random.split(key, 4)

    # --- Test 1: module-default small config (f32, single full-extent block) --
    batch, seq, hidden = 2, 8, 32
    x = jax.random.normal(k1, (batch, seq, hidden), dtype=jnp.float32)
    weight = jnp.ones((hidden,), dtype=jnp.float32)        # torch.ones init
    out = qwen2_rmsnorm(x, weight, eps=1e-6)
    jax.block_until_ready(out)
    ref = _reference_rmsnorm(x, weight, eps=1e-6)
    assert out.shape == x.shape, (out.shape, x.shape)
    assert out.dtype == ref.dtype, (out.dtype, ref.dtype)
    assert jnp.allclose(out, ref, atol=1e-5, rtol=1e-5), "f32 mismatch vs reference"

    # --- Test 2: bf16 activations + ragged last row-tile (masked writeback) ---
    batch, seq, hidden = 2, 13, 256                        # R = 26 rows, not tile-aligned
    xb = jax.random.normal(k2, (batch, seq, hidden), dtype=jnp.float32).astype(jnp.bfloat16)
    wb = 1.0 + 0.1 * jax.random.normal(k3, (hidden,), dtype=jnp.float32)
    outb = qwen2_rmsnorm(xb, wb, eps=1e-6, max_tile_rows=16)   # force grid=2 + ragged tail
    jax.block_until_ready(outb)
    refb = _reference_rmsnorm(xb, wb, eps=1e-6)
    assert outb.shape == xb.shape, (outb.shape, xb.shape)
    assert outb.dtype == refb.dtype, (outb.dtype, refb.dtype)  # torch promotion -> f32
    assert jnp.allclose(outb.astype(jnp.float32), refb.astype(jnp.float32),
                        atol=1e-2, rtol=1e-2), "bf16 mismatch vs reference"

    # --- Test 3: min-grid pipelining path + weight-in-input-dtype fast path ---
    batch, seq, hidden = 4, 64, 128                        # R = 256 -> forced grid of 8
    xc = jax.random.normal(k4, (batch, seq, hidden), dtype=jnp.float32).astype(jnp.bfloat16)
    wc = 1.0 + 0.1 * jax.random.normal(k3, (hidden,), dtype=jnp.float32)
    outc = qwen2_rmsnorm(xc, wc, eps=1e-6, weight_in_input_dtype=True)
    jax.block_until_ready(outc)
    refc = _reference_rmsnorm(xc, wc.astype(jnp.bfloat16), eps=1e-6)
    assert outc.shape == xc.shape, (outc.shape, xc.shape)
    assert outc.dtype == jnp.bfloat16, outc.dtype            # fast path: no f32 output write
    assert jnp.allclose(outc.astype(jnp.float32), refc.astype(jnp.float32),
                        atol=2e-2, rtol=2e-2), "bf16 fast-path mismatch vs reference"

    print("KERNEL_OK")
</pallas_src>

<mosaic_0001>
module attributes {stable_mosaic.version = 11 : i64} {
  func.func @_rmsnorm_kernel(%arg0: i32, %arg1: memref<16x32xf32, #tpu.memory_space<vmem>>, %arg2: memref<1x32xf32, #tpu.memory_space<vmem>>, %arg3: memref<16x32xf32, #tpu.memory_space<vmem>>) attributes {dimension_semantics = [#tpu.dimension_semantics<parallel>], iteration_bounds = array<i64: 1>, scalar_prefetch = 0 : i64, scratch_operands = 0 : i64, tpu.core_type = #tpu.core_type<tc>, window_params = [{transform_indices = @transform_0, window_bounds = array<i64: 16, 32>}, {pipeline_mode = #tpu.pipeline_mode<synchronous>, transform_indices = @transform_1, window_bounds = array<i64: 1, 32>}, {transform_indices = @transform_2, window_bounds = array<i64: 16, 32>}]} {
    %c0 = arith.constant 0 : index
    %c0_0 = arith.constant 0 : index
    %0 = vector.load %arg1[%c0, %c0_0] : memref<16x32xf32, #tpu.memory_space<vmem>>, vector<16x32xf32>
    %1 = arith.mulf %0, %0 : vector<16x32xf32>
    %cst = arith.constant dense<0.000000e+00> : vector<16xf32>
    %2 = vector.multi_reduction <add>, %1, %cst [1] : vector<16x32xf32> to vector<16xf32>
    %3 = vector.shape_cast %2 : vector<16xf32> to vector<16x1xf32>
    %cst_1 = arith.constant 3.200000e+01 : f32
    %4 = vector.broadcast %cst_1 : f32 to vector<16x1xf32>
    %5 = arith.divf %3, %4 : vector<16x1xf32>
    %cst_2 = arith.constant 9.99999997E-7 : f32
    %6 = vector.broadcast %cst_2 : f32 to vector<16x1xf32>
    %7 = arith.addf %5, %6 : vector<16x1xf32>
    %8 = math.rsqrt %7 : vector<16x1xf32>
    %9 = vector.broadcast %8 : vector<16x1xf32> to vector<16x32xf32>
    %10 = arith.mulf %0, %9 : vector<16x32xf32>
    %c0_3 = arith.constant 0 : index
    %c0_4 = arith.constant 0 : index
    %11 = vector.load %arg2[%c0_3, %c0_4] : memref<1x32xf32, #tpu.memory_space<vmem>>, vector<1x32xf32>
    %12 = vector.broadcast %11 : vector<1x32xf32> to vector<16x32xf32>
    %13 = arith.mulf %12, %10 : vector<16x32xf32>
    %c0_5 = arith.constant 0 : index
    %c0_6 = arith.constant 0 : index
    %14 = vector.load %arg3[%c0_5, %c0_6] : memref<16x32xf32, #tpu.memory_space<vmem>>, vector<16x32xf32>
    tpu.vector_store %arg3[%c0_5, %c0_6], %13 {strides = array<i32>} : memref<16x32xf32, #tpu.memory_space<vmem>>, vector<16x32xf32>,
    return
  }
  func.func @transform_0(%arg0: i32) -> (i32, i32) {
    %c0_i32 = arith.constant 0 : i32
    %c0_i32_0 = arith.constant 0 : i32
    return %arg0, %c0_i32 : i32, i32
  }
  func.func @transform_1(%arg0: i32) -> (i32, i32) {
    %c0_i32 = arith.constant 0 : i32
    %c0_i32_0 = arith.constant 0 : i32
    %c0_i32_1 = arith.constant 0 : i32
    return %c0_i32, %c0_i32_0 : i32, i32
  }
  func.func @transform_2(%arg0: i32) -> (i32, i32) {
    %c0_i32 = arith.constant 0 : i32
    %c0_i32_0 = arith.constant 0 : i32
    return %arg0, %c0_i32 : i32, i32
  }
}

</mosaic_0001>

<bundles_post_ra>
// kernel: tpu_custom_call.1
= control target key start
LH: loop header
LB: loop body
LE: loop exit
PB: predicated region body
PF: predicated region fallthrough
CT: control target
= control target key end

     0   :  { %7 = vsyncpa [#allocation3], 0  ;;  %s187_s0 = inlined_call_operand.hbm [shape: f32[16,32], index: 0, kind: input, shape index: {}]   ;;  %s188_s1 = inlined_call_operand.vmem [shape: f32[1,32], index: 1, kind: input, shape index: {}]   ;;  %s189_s2 = inlined_call_operand.hbm [shape: f32[16,32], index: 2, kind: output, shape index: {}]  }
   0x1   :  { %8 = vsyncpa [#allocation4], 0  ;;  %s131_s9 = smov [#allocation2]   ;;  %s83_s13 = scalar_lea.hbm %s187_s0, 256 }
   0x2   :  { %s14_s10 = sshll.u32 %s131_s9, 4  ;;  %p84_p0 = scmp.ne.s32.totalorder %s187_s0, %s83_s13  ;;  %s15_s10 = int_to_ptr.vmem [resolvable:$true] %s14_s10 }
   0x3   :  { %p87_p1 = scmp.lt.u32.totalorder %s83_s13, %s187_s0 }
   0x5   :  { %p89_p2 = pnand %p87_p1, %p84_p0 }
   0x7   :  { %92 = shalt.err (!%p89_p2)
}
   0x8   :  { %s93_s18 = scalar_lea.vmem %s15_s10, 256  ;;  %p98_p4 = scmp.lt.s32.totalorder %s15_s10, %s15_s10 }
   0x9   :  { %p94_p3 = scmp.ne.s32.totalorder %s15_s10, %s93_s18  ;;  %p99_p5 = scmp.lt.s32.totalorder %s93_s18, %s93_s18 }
   0xb   :  { %p100_p6 = por %p99_p5, %p98_p4 }
   0xd   :  { %p101_p7 = pnand %p100_p6, %p94_p3 }
   0xf   :  { %104 = shalt.err (!%p101_p7)
}
  0x10   :  { %s132_s19 = smov 128   ;;  %s133_s20 = smov 8  }
  0x11   :  { %20 = dma.hbm_to_vmem [thread:$0]  %s187_s0, 256, %s15_s10, [#allocation3], %s132_s19, %s132_s19, %s133_s20  }
  0x12   :  { %127 = dma.done.wait [#allocation3], 256  }
  0x13   :  { %128 = vsyncadd [#allocation3], 4294967040  ;;  %v26_v0 = vld [vmem:[#allocation2] sm:$0xff]  ;;  %vm30_vm0 = vcmask 261120   ;;  %v27_v1 = vld [vmem:[#allocation2 + $0x8] sm:$0xff]  ;;  %s134_s24 = smov [#allocation5]  }
  0x14   :  { %v28_v2 = vmul.f32 %v26_v0, %v26_v0  ;;  %v29_v3 = vmul.f32 %v27_v1, %v27_v1  ;;  %v74_v13 = vld [vmem:[%s188_s1] ss:$0 sm:$0xff]  ;;  %s62_s25 = sshll.u32 %s134_s24, 4  ;;  %s63_s25 = int_to_ptr.vmem [resolvable:$true] %s62_s25 }
  0x15   :  { %s105_s26 = scalar_lea.vmem %s63_s25, 256  ;;  %p110_p9 = scmp.lt.s32.totalorder %s63_s25, %s63_s25 }
  0x16   :  { %v31_v4 = vsel %vm30_vm0, %v28_v2, 0.0  ;;  %v34_v5 = vsel %vm30_vm0, %v29_v3, 0.0  ;;  %p106_p8 = scmp.ne.s32.totalorder %s63_s25, %s105_s26  ;;  %p111_p10 = scmp.lt.s32.totalorder %s105_s26, %s105_s26 }
  0x17   :  { %32 = vadd.xlane.f32.xlu0 %v31_v4 }
  0x18   :  { %p112_p11 = por %p111_p10, %p110_p9 }
  0x1a   :  { %p113_p12 = pnand %p112_p11, %p106_p8 }
  0x1b   :  { %35 = vadd.xlane.f32.xlu0 %v34_v5 }
  0xa4   :  { %v33_v6 = vpop.xlane.xlu0 %32 }
  0xa5   :  { %v38_v7 = vmul.f32 0.03125, %v33_v6 }
  0xa7   :  { %v40_v8 = vadd.f32 1e-06, %v38_v7 }
  0xa8   :  { %v36_v9 = vpop.xlane.xlu0 %35 }
  0xa9   :  { %79 = vrsqrt.f32 %v40_v8  ;;  %v39_v10 = vmul.f32 0.03125, %v36_v9 }
  0xab   :  { %v41_v11 = vadd.f32 1e-06, %v39_v10 }
  0xad   :  { %81 = vrsqrt.f32 %v41_v11 }
  0xb3   :  { %v80_v12 = vpop.eup %79 }
  0xb4   :  { %v44_v14 = vmul.f32 %v80_v12, %v26_v0 }
  0xb6   :  { %v53_v15 = vmul.f32 %v74_v13, %v44_v14 }
  0xb7   :  { %v82_v16 = vpop.eup %81 }
  0xb8   :  { %v45_v17 = vmul.f32 %v82_v16, %v27_v1  ;;  %55 = vst.msk [vmem:[#allocation5] sm:$0xff] %vm30_vm0, %v53_v15 }
  0xba   :  { %v54_v18 = vmul.f32 %v74_v13, %v45_v17 }
  0xbc   :  { %56 = vst.msk [vmem:[#allocation5 + $0x8] sm:$0xff] %vm30_vm0, %v54_v18 }
  0xbd   :  { %116 = shalt.err (!%p113_p12)
}
  0xbe   :  { %s117_s28 = scalar_lea.hbm %s189_s2, 256 }
  0xbf   :  { %p118_p13 = scmp.ne.s32.totalorder %s189_s2, %s117_s28  ;;  %p121_p0 = scmp.lt.u32.totalorder %s117_s28, %s189_s2 }
  0xc1   :  { %p123_p1 = pnand %p121_p0, %p118_p13 }
  0xc3   :  { %126 = shalt.err (!%p123_p1)
}
  0xc4   :  { %68 = dma.vmem_to_hbm [thread:$0]  %s63_s25, 256, %s189_s2, [#allocation4], %s132_s19, %s132_s19, %s133_s20  }
  0xc5   :  { %129 = dma.done.wait [#allocation4], 256  }
  0xc6   :  { %130 = vsyncadd [#allocation4], 4294967040 }
  0xc7   :  { %72 = vsyncpa [#allocation3], 1 }
  0xc8   :  { %73 = vsyncpa [#allocation4], 1 }

</bundles_post_ra>
